<compile_context>
chip_gen: v6e
topology: v6e:2x2x1
jax: 0.10.0
libtpu: 0.0.40
codegen_flags: <defaults>
</compile_context>

<pallas_src>
import functools

import jax
import jax.numpy as jnp
from jax.experimental import pallas as pl
from jax.experimental.pallas import tpu as pltpu


def _round_up(v, m):
    return (v + m - 1) // m * m


def dqn_kernel(x_ref, w1_ref, b1_ref, w2_ref, b2_ref, o_ref):
    """One batch tile: flattened x @ W1 + b1 -> ReLU -> @ W2 + b2."""
    # x arrives as f32; pack to bf16 on the VPU right before the MXU (free filler in
    # this DMA/overhead-bound kernel). Accumulate, bias add and ReLU in f32.
    x_bf = x_ref[...].astype(jnp.bfloat16)
    h = jnp.dot(x_bf, w1_ref[...], preferred_element_type=jnp.float32)
    h = jnp.maximum(h + b1_ref[...], 0.0)
    out = jnp.dot(h.astype(jnp.bfloat16), w2_ref[...],
                  preferred_element_type=jnp.float32)
    o_ref[...] = (out + b2_ref[...]).astype(o_ref.dtype)


def prepare_dqn_params(w1, b1, w2, b2):
    """One-time parameter prep (call at init, reuse the results every forward call).

    Casts weights to bf16 for the MXU and zero-pads the output feature dim up to a
    multiple of 128 so the kernel's stores are lane-dense (unmasked vst). Persisting
    these arrays removes the per-call convert/pad XLA passes that previously cost as
    much HBM traffic as the kernel itself.
    """
    H, O = w2.shape
    O_pad = _round_up(max(O, 128), 128)
    w1_bf = jnp.asarray(w1, jnp.bfloat16)
    b1_f = jnp.asarray(b1, jnp.float32).reshape(1, H)
    w2_bf = jnp.zeros((H, O_pad), jnp.bfloat16).at[:, :O].set(
        jnp.asarray(w2, jnp.bfloat16))
    b2_f = jnp.zeros((1, O_pad), jnp.float32).at[:, :O].set(
        jnp.asarray(b2, jnp.float32))
    return w1_bf, b1_f, w2_bf, b2_f


def _pick_batch_tiling(B):
    """Returns (tile_rows, padded_batch).

    Tiny batches (acting loop): one full-extent tile, no padding pass.
    Training batches: tiles up to 512 rows amortize the ~0.35 us per-grid-step overhead
    (v5e/v6e), but nb is kept >= 2 whenever possible so v7x's 2 TensorCores both get a
    tile via the 'parallel' batch axis.
    """
    if B < 128:
        return B, B
    Bp128 = _round_up(B, 128)
    tb = min(512, max(128, (Bp128 // 2) // 128 * 128))
    return tb, _round_up(B, tb)


@functools.partial(jax.jit, static_argnames=("out_dim", "return_padded"))
def dqn_forward(x, w1_bf, b1_f, w2_bf, b2_f, *, out_dim, return_padded=False):
    """DQN forward: Flatten -> Linear(F,H) -> ReLU -> Linear(H,O).

    x: (B, ...) float; parameters come from prepare_dqn_params (bf16 weights, O padded
    to a multiple of 128). Returns (B, out_dim) f32 — or the padded (Bp, O_pad) slab if
    return_padded=True for consumers that want to avoid the extra narrow-slice pass
    (padded columns >= out_dim hold zeros; mask them before any argmax).
    """
    B = x.shape[0]
    x2d = x.reshape(B, -1).astype(jnp.float32)      # nn.Flatten(); free metadata op
    F = x2d.shape[1]
    H = w1_bf.shape[1]
    O_pad = w2_bf.shape[1]

    tb, Bp = _pick_batch_tiling(B)
    if Bp != B:
        x2d = jnp.pad(x2d, ((0, Bp - B), (0, 0)))
    nb = Bp // tb

    cost = pl.CostEstimate(
        flops=2 * Bp * (F * H + H * O_pad),
        transcendentals=0,
        bytes_accessed=(Bp * F * 4            # x (f32, streamed)
                        + F * H * 2           # w1 (bf16, resident)
                        + H * O_pad * 2       # w2 (bf16, resident)
                        + H * 4 + O_pad * 4   # biases (f32)
                        + Bp * O_pad * 4),    # out (f32)
    )

    # Weights/biases use grid-invariant index_maps -> DMA'd into VMEM once and kept
    # resident across the batch grid; only x / out tiles stream.
    # (pl.Buffered(1) on the weight specs would shave ~0.3 MiB of double-buffer VMEM,
    #  but VMEM is a non-issue at these sizes on all generations, so it is omitted.)
    out_padded = pl.pallas_call(
        dqn_kernel,
        out_shape=jax.ShapeDtypeStruct((Bp, O_pad), jnp.float32),
        grid=(nb,),
        in_specs=[
            pl.BlockSpec((tb, F), lambda i: (i, 0)),        # x tiles stream
            pl.BlockSpec((F, H), lambda i: (0, 0)),         # weights resident
            pl.BlockSpec((1, H), lambda i: (0, 0)),
            pl.BlockSpec((H, O_pad), lambda i: (0, 0)),
            pl.BlockSpec((1, O_pad), lambda i: (0, 0)),
        ],
        out_specs=pl.BlockSpec((tb, O_pad), lambda i: (i, 0)),
        compiler_params=pltpu.CompilerParams(
            dimension_semantics=("parallel",),   # v7x: shard batch tiles over 2 TCs
            vmem_limit_bytes=16 << 20,           # worst-case working set ~6 MiB @ tb=512
        ),
        cost_estimate=cost,
    )(x2d, w1_bf, b1_f, w2_bf, b2_f)

    if return_padded:
        return out_padded
    return out_padded[:B, :out_dim]


def init_dqn_params(key, input_dim, output_dim, hidden_dim=128, dtype=jnp.float32):
    """Deterministic init mimicking nn.Linear's uniform(-1/sqrt(fan_in), 1/sqrt(fan_in))."""
    k1, k2, k3, k4 = jax.random.split(key, 4)
    lim1 = 1.0 / jnp.sqrt(jnp.array(input_dim, dtype))
    lim2 = 1.0 / jnp.sqrt(jnp.array(hidden_dim, dtype))
    # Stored as (in, out) = PyTorch weight.T so the kernel does plain x @ W.
    w1 = jax.random.uniform(k1, (input_dim, hidden_dim), dtype, -lim1, lim1)
    b1 = jax.random.uniform(k2, (hidden_dim,), dtype, -lim1, lim1)
    w2 = jax.random.uniform(k3, (hidden_dim, output_dim), dtype, -lim2, lim2)
    b2 = jax.random.uniform(k4, (output_dim,), dtype, -lim2, lim2)
    return w1, b1, w2, b2


if __name__ == "__main__":
    key = jax.random.PRNGKey(0)
    kx, kp = jax.random.split(key)

    # NCHW observation; Flatten -> input_dim = 4*16*16 = 1024.
    B, C, Hs, Ws = 2, 4, 16, 16
    input_dim = C * Hs * Ws
    hidden_dim = 128
    output_dim = 8

    x = jax.random.normal(kx, (B, C, Hs, Ws), jnp.float32)
    w1, b1, w2, b2 = init_dqn_params(kp, input_dim, output_dim, hidden_dim)

    # One-time prep; these persist across calls (no per-call convert/pad passes).
    params = prepare_dqn_params(w1, b1, w2, b2)

    # Acting-loop sized batch (single full-extent tile path).
    out = jax.block_until_ready(dqn_forward(x, *params, out_dim=output_dim))

    # Reference in plain f32 JAX (kernel uses bf16 MXU inputs -> loose tolerance).
    x2d = x.reshape(B, -1)
    ref = jnp.maximum(x2d @ w1 + b1, 0.0) @ w2 + b2
    assert out.shape == (B, output_dim)
    assert jnp.allclose(out, ref, atol=5e-2, rtol=5e-2), (
        float(jnp.max(jnp.abs(out - ref))))

    # Training-sized batch exercises the tiled grid / multi-TC path (nb >= 2).
    xb = jax.random.normal(kx, (256, C, Hs, Ws), jnp.float32)
    outb = jax.block_until_ready(dqn_forward(xb, *params, out_dim=output_dim))
    refb = jnp.maximum(xb.reshape(256, -1) @ w1 + b1, 0.0) @ w2 + b2
    assert outb.shape == (256, output_dim)
    assert jnp.allclose(outb, refb, atol=5e-2, rtol=5e-2), (
        float(jnp.max(jnp.abs(outb - refb))))

    print("KERNEL_OK")
</pallas_src>

<mosaic_0001>
module attributes {stable_mosaic.version = 11 : i64} {
  func.func @dqn_kernel(%arg0: i32, %arg1: memref<2x1024xf32, #tpu.memory_space<vmem>>, %arg2: memref<1024x128xbf16, #tpu.memory_space<vmem>>, %arg3: memref<1x128xf32, #tpu.memory_space<vmem>>, %arg4: memref<128x128xbf16, #tpu.memory_space<vmem>>, %arg5: memref<1x128xf32, #tpu.memory_space<vmem>>, %arg6: memref<2x128xf32, #tpu.memory_space<vmem>>) attributes {dimension_semantics = [#tpu.dimension_semantics<parallel>], iteration_bounds = array<i64: 1>, scalar_prefetch = 0 : i64, scratch_operands = 0 : i64, tpu.core_type = #tpu.core_type<tc>, window_params = [{transform_indices = @transform_0, window_bounds = array<i64: 2, 1024>}, {pipeline_mode = #tpu.pipeline_mode<synchronous>, transform_indices = @transform_1, window_bounds = array<i64: 1024, 128>}, {pipeline_mode = #tpu.pipeline_mode<synchronous>, transform_indices = @transform_2, window_bounds = array<i64: 1, 128>}, {pipeline_mode = #tpu.pipeline_mode<synchronous>, transform_indices = @transform_3, window_bounds = array<i64: 128, 128>}, {pipeline_mode = #tpu.pipeline_mode<synchronous>, transform_indices = @transform_4, window_bounds = array<i64: 1, 128>}, {transform_indices = @transform_5, window_bounds = array<i64: 2, 128>}]} {
    %c0 = arith.constant 0 : index
    %c0_0 = arith.constant 0 : index
    %0 = vector.load %arg1[%c0, %c0_0] : memref<2x1024xf32, #tpu.memory_space<vmem>>, vector<2x1024xf32>
    %1 = arith.truncf %0 : vector<2x1024xf32> to vector<2x1024xbf16>
    %c0_1 = arith.constant 0 : index
    %c0_2 = arith.constant 0 : index
    %2 = vector.load %arg2[%c0_1, %c0_2] : memref<1024x128xbf16, #tpu.memory_space<vmem>>, vector<1024x128xbf16>
    %cst = arith.constant dense<0.000000e+00> : vector<2x128xf32>
    %3 = tpu.matmul %1, %2, %cst {dimension_numbers = #tpu.dot_dimension_numbers<[1], [0], [0], [1], [0, 0, 1, 1], [], []>} : vector<2x1024xbf16>, vector<1024x128xbf16>, vector<2x128xf32> -> vector<2x128xf32>
    %c0_3 = arith.constant 0 : index
    %c0_4 = arith.constant 0 : index
    %4 = vector.load %arg3[%c0_3, %c0_4] : memref<1x128xf32, #tpu.memory_space<vmem>>, vector<1x128xf32>
    %5 = vector.broadcast %4 : vector<1x128xf32> to vector<2x128xf32>
    %6 = arith.addf %3, %5 : vector<2x128xf32>
    %cst_5 = arith.constant 0.000000e+00 : f32
    %7 = vector.broadcast %cst_5 : f32 to vector<2x128xf32>
    %8 = arith.maximumf %6, %7 : vector<2x128xf32>
    %9 = arith.truncf %8 : vector<2x128xf32> to vector<2x128xbf16>
    %c0_6 = arith.constant 0 : index
    %c0_7 = arith.constant 0 : index
    %10 = vector.load %arg4[%c0_6, %c0_7] : memref<128x128xbf16, #tpu.memory_space<vmem>>, vector<128x128xbf16>
    %cst_8 = arith.constant dense<0.000000e+00> : vector<2x128xf32>
    %11 = tpu.matmul %9, %10, %cst_8 {dimension_numbers = #tpu.dot_dimension_numbers<[1], [0], [0], [1], [0, 0, 1, 1], [], []>} : vector<2x128xbf16>, vector<128x128xbf16>, vector<2x128xf32> -> vector<2x128xf32>
    %c0_9 = arith.constant 0 : index
    %c0_10 = arith.constant 0 : index
    %12 = vector.load %arg5[%c0_9, %c0_10] : memref<1x128xf32, #tpu.memory_space<vmem>>, vector<1x128xf32>
    %13 = vector.broadcast %12 : vector<1x128xf32> to vector<2x128xf32>
    %14 = arith.addf %11, %13 : vector<2x128xf32>
    %c0_11 = arith.constant 0 : index
    %c0_12 = arith.constant 0 : index
    %15 = vector.load %arg6[%c0_11, %c0_12] : memref<2x128xf32, #tpu.memory_space<vmem>>, vector<2x128xf32>
    tpu.vector_store %arg6[%c0_11, %c0_12], %14 {strides = array<i32>} : memref<2x128xf32, #tpu.memory_space<vmem>>, vector<2x128xf32>,
    return
  }
  func.func @transform_0(%arg0: i32) -> (i32, i32) {
    %c0_i32 = arith.constant 0 : i32
    %c0_i32_0 = arith.constant 0 : i32
    return %arg0, %c0_i32 : i32, i32
  }
  func.func @transform_1(%arg0: i32) -> (i32, i32) {
    %c0_i32 = arith.constant 0 : i32
    %c0_i32_0 = arith.constant 0 : i32
    %c0_i32_1 = arith.constant 0 : i32
    return %c0_i32, %c0_i32_0 : i32, i32
  }
  func.func @transform_2(%arg0: i32) -> (i32, i32) {
    %c0_i32 = arith.constant 0 : i32
    %c0_i32_0 = arith.constant 0 : i32
    %c0_i32_1 = arith.constant 0 : i32
    return %c0_i32, %c0_i32_0 : i32, i32
  }
  func.func @transform_3(%arg0: i32) -> (i32, i32) {
    %c0_i32 = arith.constant 0 : i32
    %c0_i32_0 = arith.constant 0 : i32
    %c0_i32_1 = arith.constant 0 : i32
    return %c0_i32, %c0_i32_0 : i32, i32
  }
  func.func @transform_4(%arg0: i32) -> (i32, i32) {
    %c0_i32 = arith.constant 0 : i32
    %c0_i32_0 = arith.constant 0 : i32
    %c0_i32_1 = arith.constant 0 : i32
    return %c0_i32, %c0_i32_0 : i32, i32
  }
  func.func @transform_5(%arg0: i32) -> (i32, i32) {
    %c0_i32 = arith.constant 0 : i32
    %c0_i32_0 = arith.constant 0 : i32
    return %arg0, %c0_i32 : i32, i32
  }
}

</mosaic_0001>

<bundles_post_ra>
// kernel: dqn_forward.1
= control target key start
LH: loop header
LB: loop body
LE: loop exit
PB: predicated region body
PF: predicated region fallthrough
CT: control target
= control target key end

     0   :  { %10 = vsyncpa [#allocation3], 0  ;;  %s1299_s0 = inlined_call_operand.vmem [shape: f32[2,1024], index: 0, kind: input, shape index: {}]   ;;  %s1300_s1 = inlined_call_operand.hbm [shape: bf16[1024,128], index: 1, kind: input, shape index: {}]   ;;  %s1301_s2 = inlined_call_operand.vmem [shape: f32[1,128], index: 2, kind: input, shape index: {}]   ;;  %s1302_s3 = inlined_call_operand.vmem [shape: bf16[128,128], index: 3, kind: input, shape index: {}]   ;;  %s1303_s4 = inlined_call_operand.vmem [shape: f32[1,128], index: 4, kind: input, shape index: {}]   ;;  %s1304_s5 = inlined_call_operand.hbm [shape: f32[2,128], index: 5, kind: output, shape index: {}]  }
   0x1   :  { %11 = vsyncpa [#allocation4], 0  ;;  %s1214_s18 = smov [#allocation2]  }
   0x2   :  { %s19_s19 = sshll.u32 %s1214_s18, 4  ;;  %s20_s19 = int_to_ptr.vmem [resolvable:$true] %s19_s19 }
   0x3   :  { %s1178_s20 = scalar_lea.vmem %s20_s19, 8192  ;;  %p1183_p1 = scmp.lt.s32.totalorder %s20_s19, %s20_s19 }
   0x4   :  { %p1179_p0 = scmp.ne.s32.totalorder %s20_s19, %s1178_s20  ;;  %p1184_p2 = scmp.lt.s32.totalorder %s1178_s20, %s1178_s20 }
   0x6   :  { %p1185_p3 = por %p1184_p2, %p1183_p1 }
   0x8   :  { %p1186_p4 = pnand %p1185_p3, %p1179_p0 }
   0xa   :  { %1189 = shalt.err (!%p1186_p4)
}
   0xb   :  { %s1215_s21 = smov 64   ;;  %s1216_s22 = smov 4  }
   0xc   :  { %25 = dma.hbm_to_vmem [thread:$0]  %s1300_s1, 8192, %s20_s19, [#allocation3], %s1215_s21, %s1215_s21, %s1216_s22  }
   0xd   :  { %1210 = dma.done.wait [#allocation3], 8192  }
   0xe   :  { %1211 = vsyncadd [#allocation3], 4294959104  ;;  %v1096_v0 = vld [vmem:[#allocation2 + $0x78] sm:$0xff]   ;;  %v1100_v4 = vld [vmem:[#allocation2 + $0x70] sm:$0xff]   ;;  %v1217_v22 = vmov 1983009808   ;;  %v44_v24 = vlaneseq }
   0xf   :  { %v1097_v1 = vld [vmem:[#allocation2 + $0xf8] sm:$0xff]   ;;  %972 = vmatprep.subr.bf16.mxu0 %v1096_v0  ;;  %v1101_v5 = vld [vmem:[#allocation2 + $0xf0] sm:$0xff]   ;;  %v1104_v8 = vld [vmem:[#allocation2 + $0x68] sm:$0xff]   ;;  %v42_v23 = vunpack.c.l.s4 %v1217_v22  ;;  %vm1219_vm0 = vmmov 0   ;;  %s1220_s20 = smov [#allocation5]  }
  0x10   :  { %v1098_v2 = vld [vmem:[#allocation2 + $0x38] sm:$0xff]   ;;  %994 = vmatprep.subr.bf16.mxu1 %v1097_v1  ;;  %v1102_v6 = vld [vmem:[#allocation2 + $0x30] sm:$0xff]   ;;  %v1105_v9 = vld [vmem:[#allocation2 + $0xe8] sm:$0xff]   ;;  %v45_v30 = vshrl.u32 %v44_v24, 7  ;;  %s889_s21 = sshll.u32 %s1220_s20, 4  ;;  %s890_s21 = int_to_ptr.vmem [resolvable:$true] %s889_s21 }
  0x11   :  { %v1099_v3 = vld [vmem:[#allocation2 + $0xb8] sm:$0xff]   ;;  %973 = vmatpush3.bf16.msra.mxu0 %v1098_v2  ;;  %v1103_v7 = vld [vmem:[#allocation2 + $0xb0] sm:$0xff]   ;;  %v1106_v10 = vld [vmem:[#allocation2 + $0x28] sm:$0xff]   ;;  %v43_v29 = vunpack.c.0.s8 %v42_v23  ;;  %s1190_s22 = scalar_lea.vmem %s890_s21, 32  ;;  %p1195_p6 = scmp.lt.s32.totalorder %s890_s21, %s890_s21 }
  0x12   :  { %995 = vmatpush3.bf16.msra.mxu1 %v1099_v3  ;;  %974 = vmatprep.subr.bf16.mxu0 %v1100_v4  ;;  %v1107_v11 = vld [vmem:[#allocation2 + $0xa8] sm:$0xff]   ;;  %v1108_v12 = vld [vmem:[#allocation2 + $0x60] sm:$0xff]   ;;  %v1112_v16 = vld [vmem:[#allocation2 + $0x58] sm:$0xff]   ;;  %p1191_p5 = scmp.ne.s32.totalorder %s890_s21, %s1190_s22  ;;  %p1196_p7 = scmp.lt.s32.totalorder %s1190_s22, %s1190_s22 }
  0x13   :  { %996 = vmatprep.subr.bf16.mxu1 %v1101_v5  ;;  %v1109_v13 = vld [vmem:[#allocation2 + $0xe0] sm:$0xff]   ;;  %v1113_v17 = vld [vmem:[#allocation2 + $0xd8] sm:$0xff]   ;;  %v1116_v20 = vld [vmem:[#allocation2 + $0x50] sm:$0xff]   ;;  %v1254_v35 = vsub.s32 %v43_v29, %v45_v30 }
  0x14   :  { %v1110_v14 = vld [vmem:[#allocation2 + $0x20] sm:$0xff]   ;;  %v1114_v18 = vld [vmem:[#allocation2 + $0x18] sm:$0xff]   ;;  %v1117_v21 = vld [vmem:[#allocation2 + $0xd0] sm:$0xff]   ;;  %p1197_p8 = por %p1196_p7, %p1195_p6 }
  0x15   :  { %975 = vmatpush3.bf16.msra.mxu0 %v1102_v6  ;;  %v1111_v15 = vld [vmem:[#allocation2 + $0xa0] sm:$0xff]   ;;  %v1115_v19 = vld [vmem:[#allocation2 + $0x98] sm:$0xff]   ;;  %v1118_v25 = vld [vmem:[#allocation2 + $0x10] sm:$0xff]  }
  0x16   :  { %997 = vmatpush3.bf16.msra.mxu1 %v1103_v7  ;;  %976 = vmatprep.subr.bf16.mxu0 %v1104_v8  ;;  %v1119_v26 = vld [vmem:[#allocation2 + $0x90] sm:$0xff]   ;;  %v1120_v27 = vld [vmem:[#allocation2 + $0x48] sm:$0xff]   ;;  %v1124_v33 = vld [vmem:[#allocation2 + $0x40] sm:$0xff]   ;;  %p1198_p9 = pnand %p1197_p8, %p1191_p5 }
  0x17   :  { %998 = vmatprep.subr.bf16.mxu1 %v1105_v9  ;;  %v1121_v28 = vld [vmem:[#allocation2 + $0xc8] sm:$0xff]   ;;  %v1125_v34 = vld [vmem:[#allocation2 + $0xc0] sm:$0xff]   ;;  %v1129_v41 = vld [vmem:[#allocation2 + $0x178] sm:$0xff]  }
  0x18   :  { %v1122_v31 = vld [vmem:[#allocation2 + $0x8] sm:$0xff]   ;;  %v1126_v36 = vld [vmem:[#allocation2] sm:$0xff]   ;;  %v1130_v42 = vld [vmem:[#allocation2 + $0x1f8] sm:$0xff]  }
  0x19   :  { %977 = vmatpush3.bf16.msra.mxu0 %v1106_v10  ;;  %v1123_v32 = vld [vmem:[#allocation2 + $0x88] sm:$0xff]   ;;  %v1127_v37 = vld [vmem:[#allocation2 + $0x80] sm:$0xff]   ;;  %v1131_v46 = vld [vmem:[#allocation2 + $0x138] sm:$0xff]  }
  0x1a   :  { %999 = vmatpush3.bf16.msra.mxu1 %v1107_v11  ;;  %978 = vmatprep.subr.bf16.mxu0 %v1108_v12  ;;  %v36_v38 = vld [vmem:[%s1299_s0] sm:$0xff]  ;;  %v1132_v49 = vld [vmem:[#allocation2 + $0x1b8] sm:$0xff]   ;;  %v1133_v51 = vld [vmem:[#allocation2 + $0x170] sm:$0xff]  }
  0x1b   :  { %1000 = vmatprep.subr.bf16.mxu1 %v1109_v13  ;;  %v47_v39 = vrot.slane %v36_v38, %v1254_v35  ;;  %v40_v40 = vcombine.high %v36_v38, %v36_v38  ;;  %v1134_v53 = vld [vmem:[#allocation2 + $0x1f0] sm:$0xff]   ;;  %v1137_v56 = vld [vmem:[#allocation2 + $0x168] sm:$0xff]   ;;  %v1141_v60 = vld [vmem:[#allocation2 + $0x160] sm:$0xff]  }
  0x1c   :  { %v1135_v54 = vld [vmem:[#allocation2 + $0x130] sm:$0xff]   ;;  %v1138_v57 = vld [vmem:[#allocation2 + $0x1e8] sm:$0xff]   ;;  %v1142_v61 = vld [vmem:[#allocation2 + $0x1e0] sm:$0xff]  }
  0x1d   :  { %979 = vmatpush3.bf16.msra.mxu0 %v1110_v14  ;;  %v55_v43 = vcombine.high %v47_v39, %v47_v39  ;;  %v54_v44 = vrot.slane %v40_v40, %v1254_v35  ;;  %v82_v45 = vpack.c.bf16 %v47_v39, %v47_v39  ;;  %v1136_v55 = vld [vmem:[#allocation2 + $0x1b0] sm:$0xff]   ;;  %v1139_v58 = vld [vmem:[#allocation2 + $0x128] sm:$0xff]   ;;  %v1143_v62 = vld [vmem:[#allocation2 + $0x120] sm:$0xff]  }
  0x1e   :  { %1001 = vmatpush3.bf16.msra.mxu1 %v1111_v15  ;;  %980 = vmatprep.subr.bf16.mxu0 %v1112_v16  ;;  %v1140_v59 = vld [vmem:[#allocation2 + $0x1a8] sm:$0xff]   ;;  %v1144_v63 = vld [vmem:[#allocation2 + $0x1a0] sm:$0xff]   ;;  %v1145_v0 = vld [vmem:[#allocation2 + $0x158] sm:$0xff]  }
  0x1f   :  { %1002 = vmatprep.subr.bf16.mxu1 %v1113_v17  ;;  %v83_v47 = vpack.c.bf16 %v55_v43, %v55_v43  ;;  %v56_v48 = vcombine.high %v54_v44, %v54_v44  ;;  %v84_v50 = vpack.c.bf16 %v54_v44, %v54_v44  ;;  %v1146_v1 = vld [vmem:[#allocation2 + $0x1d8] sm:$0xff]   ;;  %v1149_v4 = vld [vmem:[#allocation2 + $0x150] sm:$0xff]   ;;  %v1153_v8 = vld [vmem:[#allocation2 + $0x148] sm:$0xff]  }
  0x20   :  { %v1147_v2 = vld [vmem:[#allocation2 + $0x118] sm:$0xff]   ;;  %v1150_v5 = vld [vmem:[#allocation2 + $0x1d0] sm:$0xff]   ;;  %v1154_v9 = vld [vmem:[#allocation2 + $0x1c8] sm:$0xff]  }
  0x21   :  { %981 = vmatpush3.bf16.msra.mxu0 %v1114_v18  ;;  %641 = vmatprep.mubr.bf16.mxu0 %v83_v47  ;;  %v85_v52 = vpack.c.bf16 %v56_v48, %v56_v48  ;;  %v1148_v3 = vld [vmem:[#allocation2 + $0x198] sm:$0xff]   ;;  %v1151_v6 = vld [vmem:[#allocation2 + $0x110] sm:$0xff]   ;;  %v1155_v10 = vld [vmem:[#allocation2 + $0x108] sm:$0xff]  }
  0x22   :  { %1003 = vmatpush3.bf16.msra.mxu1 %v1115_v19  ;;  %982 = vmatprep.subr.bf16.mxu0 %v1116_v20  ;;  %v1152_v7 = vld [vmem:[#allocation2 + $0x190] sm:$0xff]   ;;  %v1156_v11 = vld [vmem:[#allocation2 + $0x188] sm:$0xff]   ;;  %v1157_v12 = vld [vmem:[#allocation2 + $0x140] sm:$0xff]  }
  0x23   :  { %1004 = vmatprep.subr.bf16.mxu1 %v1117_v21  ;;  %681 = vmatprep.mubr.bf16.mxu1 %v85_v52  ;;  %v1158_v13 = vld [vmem:[#allocation2 + $0x1c0] sm:$0xff]   ;;  %v37_v15 = vld [vmem:[%s1299_s0 + $0x8] sm:$0xff] }
  0x24   :  { %v1159_v14 = vld [vmem:[#allocation2 + $0x100] sm:$0xff]   ;;  %v64_v17 = vrot.slane %v37_v15, %v1254_v35  ;;  %v57_v18 = vcombine.high %v37_v15, %v37_v15  ;;  %v1164_v29 = vld [vmem:[%s1302_s3 + $0x28] sm:$0xff]  }
  0x25   :  { %983 = vmatpush3.bf16.msra.mxu0 %v1118_v25  ;;  %v1160_v16 = vld [vmem:[#allocation2 + $0x180] sm:$0xff]  }
  0x26   :  { %1005 = vmatpush3.bf16.msra.mxu1 %v1119_v26  ;;  %984 = vmatprep.subr.bf16.mxu0 %v1120_v27  ;;  %v72_v19 = vcombine.high %v64_v17, %v64_v17  ;;  %v71_v20 = vrot.slane %v57_v18, %v1254_v35  ;;  %v86_v21 = vpack.c.bf16 %v64_v17, %v64_v17  ;;  %v1162_v26 = vld [vmem:[%s1302_s3 + $0x38] sm:$0xff]   ;;  %v1218_v27 = vmov 0.0   ;;  %v1165_v30 = vld [vmem:[%s1302_s3 + $0x20] sm:$0xff]  }
  0x27   :  { %1006 = vmatprep.subr.bf16.mxu1 %v1121_v28  ;;  %v1163_v28 = vld [vmem:[%s1302_s3 + $0x30] sm:$0xff]   ;;  %v898_v44 = vld [vmem:[%s1301_s2] ss:$0 sm:$0xff] }
  0x28   :  { %v87_v22 = vpack.c.bf16 %v72_v19, %v72_v19  ;;  %v73_v23 = vcombine.high %v71_v20, %v71_v20  ;;  %v88_v24 = vpack.c.bf16 %v71_v20, %v71_v20 }
  0x29   :  { %985 = vmatpush3.bf16.msra.mxu0 %v1122_v31  ;;  %v1166_v31 = vld [vmem:[%s1302_s3 + $0x18] sm:$0xff]  }
  0x2a   :  { %1007 = vmatpush3.bf16.msra.mxu1 %v1123_v32  ;;  %986 = vmatprep.subr.bf16.mxu0 %v1124_v33  ;;  %v89_v25 = vpack.c.bf16 %v73_v23, %v73_v23  ;;  %v1167_v32 = vld [vmem:[%s1302_s3 + $0x10] sm:$0xff]   ;;  %v1168_v33 = vld [vmem:[%s1302_s3 + $0x8] sm:$0xff]  }
  0x2b   :  { %1008 = vmatprep.subr.bf16.mxu1 %v1125_v34  ;;  %v1169_v34 = vld [vmem:[%s1302_s3] sm:$0xff]  }
  0x2d   :  { %987 = vmatpush3.bf16.msra.mxu0 %v1126_v36 }
  0x2e   :  { %1009 = vmatpush3.bf16.msra.mxu1 %v1127_v37  ;;  %1016 = vmatprep.subr.bf16.mxu0 %v1129_v41 }
  0x2f   :  { %1038 = vmatprep.subr.bf16.mxu1 %v1130_v42 }
  0x30   :  { %642 = vmatmul.mubr.bf16.vlgmr.msra.gmra.mxu0 %v82_v45 }
  0x31   :  { %1017 = vmatpush3.bf16.msra.mxu0 %v1131_v46  ;;  %682 = vmatmul.mubr.bf16.vlgmr.msra.gmra.mxu1 %v84_v50 }
  0x32   :  { %1018 = vmatprep.subr.bf16.mxu0 %v1133_v51  ;;  %1039 = vmatpush3.bf16.msra.mxu1 %v1132_v49 }
  0x33   :  { %1040 = vmatprep.subr.bf16.mxu1 %v1134_v53  ;;  %721 = vmatprep.mubr.bf16.mxu0 %v87_v22 }
  0x34   :  { %761 = vmatprep.mubr.bf16.mxu1 %v89_v25 }
  0x35   :  { %1019 = vmatpush3.bf16.msra.mxu0 %v1135_v54 }
  0x36   :  { %1020 = vmatprep.subr.bf16.mxu0 %v1137_v56  ;;  %1041 = vmatpush3.bf16.msra.mxu1 %v1136_v55 }
  0x37   :  { %1042 = vmatprep.subr.bf16.mxu1 %v1138_v57 }
  0x39   :  { %1021 = vmatpush3.bf16.msra.mxu0 %v1139_v58 }
  0x3a   :  { %1022 = vmatprep.subr.bf16.mxu0 %v1141_v60  ;;  %1043 = vmatpush3.bf16.msra.mxu1 %v1140_v59 }
  0x3b   :  { %1044 = vmatprep.subr.bf16.mxu1 %v1142_v61 }
  0x3d   :  { %1023 = vmatpush3.bf16.msra.mxu0 %v1143_v62  ;;  %v963_v62 = vld [vmem:[%s1303_s4] ss:$0 sm:$0xff] }
  0x3e   :  { %1024 = vmatprep.subr.bf16.mxu0 %v1145_v0  ;;  %1045 = vmatpush3.bf16.msra.mxu1 %v1144_v63 }
  0x3f   :  { %1046 = vmatprep.subr.bf16.mxu1 %v1146_v1 }
  0x41   :  { %1025 = vmatpush3.bf16.msra.mxu0 %v1147_v2 }
  0x42   :  { %1026 = vmatprep.subr.bf16.mxu0 %v1149_v4  ;;  %1047 = vmatpush3.bf16.msra.mxu1 %v1148_v3 }
  0x43   :  { %1048 = vmatprep.subr.bf16.mxu1 %v1150_v5 }
  0x45   :  { %1027 = vmatpush3.bf16.msra.mxu0 %v1151_v6 }
  0x46   :  { %1028 = vmatprep.subr.bf16.mxu0 %v1153_v8  ;;  %1049 = vmatpush3.bf16.msra.mxu1 %v1152_v7 }
  0x47   :  { %1050 = vmatprep.subr.bf16.mxu1 %v1154_v9 }
  0x49   :  { %1029 = vmatpush3.bf16.msra.mxu0 %v1155_v10 }
  0x4a   :  { %1030 = vmatprep.subr.bf16.mxu0 %v1157_v12  ;;  %1051 = vmatpush3.bf16.msra.mxu1 %v1156_v11 }
  0x4b   :  { %1052 = vmatprep.subr.bf16.mxu1 %v1158_v13 }
  0x4d   :  { %1031 = vmatpush3.bf16.msra.mxu0 %v1159_v14 }
  0x4e   :  { %1053 = vmatpush3.bf16.msra.mxu1 %v1160_v16  ;;  %1069 = vmatprep.subr.bf16.mxu0 %v1218_v27 }
  0x50   :  { %722 = vmatmul.mubr.bf16.vlgmr.msra.gmra.mxu0 %v86_v21 }
  0x51   :  { %762 = vmatmul.mubr.bf16.vlgmr.msra.gmra.mxu1 %v88_v24  ;;  %1070 = vmatpush3.bf16.msra.mxu0 %v1162_v26 }
  0x52   :  { %1071 = vmatprep.subr.bf16.mxu0 %v1218_v27  ;;  %1085 = vmatprep.mubr.msk.bf16.mxu0 %vm1219_vm0, %v1218_v27 }
  0x55   :  { %1072 = vmatpush3.bf16.msra.mxu0 %v1163_v28 }
  0x56   :  { %1073 = vmatprep.subr.bf16.mxu0 %v1218_v27 }
  0x59   :  { %1074 = vmatpush3.bf16.msra.mxu0 %v1164_v29 }
  0x5a   :  { %1075 = vmatprep.subr.bf16.mxu0 %v1218_v27 }
  0x5d   :  { %1076 = vmatpush3.bf16.msra.mxu0 %v1165_v30 }
  0x5e   :  { %1077 = vmatprep.subr.bf16.mxu0 %v1218_v27 }
  0x61   :  { %1078 = vmatpush3.bf16.msra.mxu0 %v1166_v31 }
  0x62   :  { %1079 = vmatprep.subr.bf16.mxu0 %v1218_v27 }
  0x65   :  { %1080 = vmatpush3.bf16.msra.mxu0 %v1167_v32 }
  0x66   :  { %1081 = vmatprep.subr.bf16.mxu0 %v1218_v27 }
  0x69   :  { %1082 = vmatpush3.bf16.msra.mxu0 %v1168_v33 }
  0x6a   :  { %1083 = vmatprep.subr.bf16.mxu0 %v1218_v27 }
  0x6d   :  { %1084 = vmatpush3.bf16.msra.mxu0 %v1169_v34 }
  0xf0   :  { %v988_v35 = vpop.f32.mrf.mxu0 }
  0xf1   :  { %v1010_v36 = vpop.f32.mrf.mxu1 }
  0xf2   :  { %v989_v37 = vpop.f32.mrf.mxu0 }
  0xf3   :  { %v1011_v38 = vpop.f32.mrf.mxu1  ;;  %v990_v43 = vadd.f32 %v989_v37, %v988_v35 }
  0xf4   :  { %v991_v39 = vpop.f32.mrf.mxu0  ;;  %v1012_v46 = vadd.f32 %v1011_v38, %v1010_v36 }
  0xf5   :  { %v1013_v40 = vpop.f32.mrf.mxu1  ;;  %v644_v45 = vadd.f32 %v990_v43, %v898_v44 }
  0xf6   :  { %v992_v41 = vpop.f32.mrf.mxu0 }
  0xf7   :  { %v1014_v42 = vpop.f32.mrf.mxu1  ;;  %v684_v50 = vadd.f32 %v1012_v46, %v644_v45 }
 0x110   :  { %v1032_v47 = vpop.f32.mrf.mxu0 }
 0x111   :  { %v1054_v48 = vpop.f32.mrf.mxu1 }
 0x112   :  { %v1033_v49 = vpop.f32.mrf.mxu0 }
 0x113   :  { %v1034_v51 = vadd.f32 %v1033_v49, %v1032_v47  ;;  %v1055_v52 = vpop.f32.mrf.mxu1 }
 0x114   :  { %v1035_v53 = vpop.f32.mrf.mxu0  ;;  %v1056_v55 = vadd.f32 %v1055_v52, %v1054_v48 }
 0x115   :  { %v724_v54 = vadd.f32 %v1034_v51, %v684_v50  ;;  %v1057_v56 = vpop.f32.mrf.mxu1 }
 0x116   :  { %v1036_v57 = vpop.f32.mrf.mxu0 }
 0x117   :  { %v764_v58 = vadd.f32 %v1056_v55, %v724_v54  ;;  %v1058_v59 = vpop.f32.mrf.mxu1 }
 0x119   :  { %v769_v60 = vmax.f32 %v764_v58, 0.0 }
 0x11b   :  { %v770_v61 = vpack.c.bf16 %v769_v60, %v769_v60 }
 0x11d   :  { %1086 = vmatmul.mubr.bf16.vlgmr.msra.gmra.mxu0 %v770_v61 }
 0x1dd   :  { %v876_v63 = vpop.f32.mrf.mxu0 }
 0x1de   :  { %v877_v0 = vadd.f32 %v963_v62, %v876_v63 }
 0x1df   :  { %v1087_v1 = vpop.f32.mrf.mxu0 }
 0x1e0   :  { %882 = vst [vmem:[#allocation5] sm:$0x3] %v877_v0 }
 0x1e1   :  { %v879_v2 = vpop.f32.mrf.mxu0 }
 0x1e2   :  { %1201 = shalt.err (!%p1198_p9)
}
 0x1e3   :  { %892 = dma.vmem_to_hbm [thread:$0]  %s890_s21, 32, %s1304_s5, [#allocation4]   ;;  %v1088_v3 = vpop.f32.mrf.mxu0 }
 0x1e4   :  { %1212 = dma.done.wait [#allocation4], 32  }
 0x1e5   :  { %1213 = vsyncadd [#allocation4], 4294967264 }
 0x1e6   :  { %896 = vsyncpa [#allocation3], 1 }
 0x1e7   :  { %897 = vsyncpa [#allocation4], 1 }

</bundles_post_ra>
